<compile_context>
chip_gen: v7x
topology: tpu7x:2x2x1
jax: 0.10.0
libtpu: 0.0.40
codegen_flags: <defaults>
</compile_context>

<pallas_src>
import math

import jax
import jax.numpy as jnp
from jax.experimental import pallas as pl
from jax.experimental.pallas import tpu as pltpu

# transconfig values relevant to this module
CYCLE_NUM = 5
D_MODEL = 7
D_IN = CYCLE_NUM * D_MODEL   # 35
FC_P = 128
OUT_SIZE = 1


def _predict_kernel(x_ref, w1_ref, w2_ref, o_ref):
    # x_ref : (TB, D_IN)    row tile of enc_outputs
    # w1_ref: (D_IN, FC_P)  first Linear weight, pre-transposed
    # w2_ref: (FC_P, OUT)   second Linear weight, pre-transposed
    # o_ref : (TB, OUT)
    x = x_ref[...]
    w1 = w1_ref[...]
    w2 = w2_ref[...]

    # hidden = relu(x @ W1^T), accumulated in f32 on the MXU
    h = jnp.dot(x, w1, preferred_element_type=jnp.float32)
    h = jnp.maximum(h, 0.0)

    # second Linear; feed the MXU the native weight dtype (bf16-friendly)
    y = jnp.dot(h.astype(w2.dtype), w2, preferred_element_type=jnp.float32)
    o_ref[...] = y.astype(o_ref.dtype)


def predict_layer(enc_outputs, w1, w2, *, block_rows=512):
    """Fused PredictLayer forward.

    enc_outputs: [..., D_IN]
    w1: [FC_P, D_IN]   (PyTorch nn.Linear weight layout, no bias)
    w2: [OUT_SIZE, FC_P]
    Returns: [..., OUT_SIZE]
    """
    lead_shape = enc_outputs.shape[:-1]
    d_in = enc_outputs.shape[-1]
    assert w1.shape[1] == d_in, "weight / input feature mismatch"
    hid = w1.shape[0]
    d_out = w2.shape[0]
    assert w2.shape[1] == hid

    # Flatten leading dims into one row axis.
    x = enc_outputs.reshape(-1, d_in)
    B = x.shape[0]

    # Transpose weights once in the wrapper so the kernel has no transposes.
    w1t = jnp.transpose(w1)   # (d_in, hid)
    w2t = jnp.transpose(w2)   # (hid, d_out)

    # Row tiling: one big step for small B; 512-row (sublane-aligned) tiles
    # otherwise, padding B so the grid divides evenly.
    if B <= block_rows:
        tb = B
        Bp = B
    else:
        tb = block_rows
        Bp = pl.cdiv(B, tb) * tb
        if Bp != B:
            x = jnp.pad(x, ((0, Bp - B), (0, 0)))
    grid = (Bp // tb,)

    y = pl.pallas_call(
        _predict_kernel,
        out_shape=jax.ShapeDtypeStruct((Bp, d_out), enc_outputs.dtype),
        grid_spec=pltpu.PrefetchScalarGridSpec(
            num_scalar_prefetch=0,
            grid=grid,
            in_specs=[
                pl.BlockSpec((tb, d_in), lambda i: (i, 0)),
                pl.BlockSpec((d_in, hid), lambda i: (0, 0)),
                pl.BlockSpec((hid, d_out), lambda i: (0, 0)),
            ],
            out_specs=pl.BlockSpec((tb, d_out), lambda i: (i, 0)),
        ),
        compiler_params=pltpu.CompilerParams(
            dimension_semantics=("parallel",),
        ),
    )(x, w1t, w2t)

    if Bp != B:
        y = y[:B]
    return y.reshape(*lead_shape, d_out)


def _reference(enc_outputs, w1, w2):
    h = jnp.maximum(enc_outputs @ w1.T, 0.0)
    return h @ w2.T


if __name__ == "__main__":
    # Small shapes consistent with the module: feature dim = cycle_num*d_model
    # = 35, hidden = fc_p = 128, output = 1; small batch of 16 rows.
    B = 16
    key = jax.random.PRNGKey(0)
    kx, k1, k2 = jax.random.split(key, 3)

    x = jax.random.normal(kx, (B, D_IN), dtype=jnp.float32)
    # PyTorch nn.Linear weight layout: [out_features, in_features], no bias.
    w1 = jax.random.normal(k1, (FC_P, D_IN), dtype=jnp.float32) * (1.0 / math.sqrt(D_IN))
    w2 = jax.random.normal(k2, (OUT_SIZE, FC_P), dtype=jnp.float32) * (1.0 / math.sqrt(FC_P))

    y = predict_layer(x, w1, w2)
    jax.block_until_ready(y)

    y_ref = _reference(x, w1, w2)
    assert y.shape == (B, OUT_SIZE)
    assert jnp.allclose(y, y_ref, atol=1e-4, rtol=1e-4)

    print("KERNEL_OK")
</pallas_src>

<mosaic_0001>
module attributes {stable_mosaic.version = 11 : i64} {
  func.func @_predict_kernel(%arg0: i32, %arg1: memref<16x35xf32, #tpu.memory_space<vmem>>, %arg2: memref<35x128xf32, #tpu.memory_space<vmem>>, %arg3: memref<128x1xf32, #tpu.memory_space<vmem>>, %arg4: memref<16x1xf32, #tpu.memory_space<vmem>>) attributes {dimension_semantics = [#tpu.dimension_semantics<parallel>], iteration_bounds = array<i64: 1>, scalar_prefetch = 0 : i64, scratch_operands = 0 : i64, tpu.core_type = #tpu.core_type<tc>, window_params = [{transform_indices = @transform_0, window_bounds = array<i64: 16, 35>}, {pipeline_mode = #tpu.pipeline_mode<synchronous>, transform_indices = @transform_1, window_bounds = array<i64: 35, 128>}, {pipeline_mode = #tpu.pipeline_mode<synchronous>, transform_indices = @transform_2, window_bounds = array<i64: 128, 1>}, {transform_indices = @transform_3, window_bounds = array<i64: 16, 1>}]} {
    %c0 = arith.constant 0 : index
    %c0_0 = arith.constant 0 : index
    %0 = vector.load %arg1[%c0, %c0_0] : memref<16x35xf32, #tpu.memory_space<vmem>>, vector<16x35xf32>
    %c0_1 = arith.constant 0 : index
    %c0_2 = arith.constant 0 : index
    %1 = vector.load %arg2[%c0_1, %c0_2] : memref<35x128xf32, #tpu.memory_space<vmem>>, vector<35x128xf32>
    %c0_3 = arith.constant 0 : index
    %c0_4 = arith.constant 0 : index
    %2 = vector.load %arg3[%c0_3, %c0_4] : memref<128x1xf32, #tpu.memory_space<vmem>>, vector<128x1xf32>
    %cst = arith.constant dense<0.000000e+00> : vector<16x128xf32>
    %3 = tpu.matmul %0, %1, %cst {dimension_numbers = #tpu.dot_dimension_numbers<[1], [0], [0], [1], [0, 0, 1, 1], [], []>} : vector<16x35xf32>, vector<35x128xf32>, vector<16x128xf32> -> vector<16x128xf32>
    %cst_5 = arith.constant 0.000000e+00 : f32
    %4 = vector.broadcast %cst_5 : f32 to vector<16x128xf32>
    %5 = arith.maximumf %3, %4 : vector<16x128xf32>
    %cst_6 = arith.constant dense<0.000000e+00> : vector<16x1xf32>
    %6 = tpu.matmul %5, %2, %cst_6 {dimension_numbers = #tpu.dot_dimension_numbers<[1], [0], [0], [1], [0, 0, 1, 1], [], []>} : vector<16x128xf32>, vector<128x1xf32>, vector<16x1xf32> -> vector<16x1xf32>
    %c0_7 = arith.constant 0 : index
    %c0_8 = arith.constant 0 : index
    %7 = vector.load %arg4[%c0_7, %c0_8] : memref<16x1xf32, #tpu.memory_space<vmem>>, vector<16x1xf32>
    tpu.vector_store %arg4[%c0_7, %c0_8], %6 {strides = array<i32>} : memref<16x1xf32, #tpu.memory_space<vmem>>, vector<16x1xf32>,
    return
  }
  func.func @transform_0(%arg0: i32) -> (i32, i32) {
    %c0_i32 = arith.constant 0 : i32
    %c0_i32_0 = arith.constant 0 : i32
    return %arg0, %c0_i32 : i32, i32
  }
  func.func @transform_1(%arg0: i32) -> (i32, i32) {
    %c0_i32 = arith.constant 0 : i32
    %c0_i32_0 = arith.constant 0 : i32
    %c0_i32_1 = arith.constant 0 : i32
    return %c0_i32, %c0_i32_0 : i32, i32
  }
  func.func @transform_2(%arg0: i32) -> (i32, i32) {
    %c0_i32 = arith.constant 0 : i32
    %c0_i32_0 = arith.constant 0 : i32
    %c0_i32_1 = arith.constant 0 : i32
    return %c0_i32, %c0_i32_0 : i32, i32
  }
  func.func @transform_3(%arg0: i32) -> (i32, i32) {
    %c0_i32 = arith.constant 0 : i32
    %c0_i32_0 = arith.constant 0 : i32
    return %arg0, %c0_i32 : i32, i32
  }
}

</mosaic_0001>

<bundles_post_ra>
// kernel: tpu_custom_call.1
= control target key start
LH: loop header
LB: loop body
LE: loop exit
PB: predicated region body
PF: predicated region fallthrough
CT: control target
= control target key end

     0   :  { %vm37_vm0 = vcmask 285696   ;;  %vm44_vm1 = vcmask 1042432   ;;  %vm200_vm2 = vcmask 7168   ;;  %s420_s1 = inlined_call_operand.vmem [shape: f32[35,128], index: 1, kind: input, shape index: {}]   ;;  %s421_s0 = inlined_call_operand.vmem [shape: f32[16,35], index: 0, kind: input, shape index: {}]   ;;  %s422_s2 = inlined_call_operand.vmem [shape: f32[128,1], index: 2, kind: input, shape index: {}]   ;;  %s423_s3 = inlined_call_operand.vmem [shape: f32[16,1], index: 3, kind: output, shape index: {}]  }
   0x1   :  { %v16_v0 = vld [vmem:[%s420_s1] sm:$0xff]  ;;  %v17_v1 = vld [vmem:[%s420_s1 + $0x8] sm:$0xff]  ;;  %v18_v2 = vld [vmem:[%s420_s1 + $0x10] sm:$0xff] }
   0x2   :  { %v283_v3 = vpack.c.bf16 %v17_v1, %v16_v0  ;;  %v19_v4 = vld [vmem:[%s420_s1 + $0x18] sm:$0xff]  ;;  %v14_v5 = vld [vmem:[%s421_s0] sm:$0xff]  ;;  %v22_v8 = vld [vmem:[%s422_s2 + $0x8] sm:$0xff] }
   0x3   :  { %v287_v6 = vpack.c.bf16 %v19_v4, %v18_v2  ;;  %245 = vmatprep.mubr.msk.f32.mxu0 %vm37_vm0, %v14_v5  ;;  %v21_v7 = vld [vmem:[%s422_s2] sm:$0xff]  ;;  %v23_v10 = vld [vmem:[%s422_s2 + $0x10] sm:$0xff]  ;;  %v24_v11 = vld [vmem:[%s422_s2 + $0x18] sm:$0xff] }
   0x4   :  { %284 = vmatprep.subr.bf16.mxu0 %v283_v3  ;;  %v291_v9 = vpack.c.bf16 %v22_v8, %v21_v7  ;;  %v295_v12 = vpack.c.bf16 %v24_v11, %v23_v10  ;;  %v25_v13 = vld [vmem:[%s422_s2 + $0x20] sm:$0xff]  ;;  %v26_v14 = vld [vmem:[%s422_s2 + $0x28] sm:$0xff]  ;;  %v27_v17 = vld [vmem:[%s422_s2 + $0x30] sm:$0xff] }
   0x5   :  { %286 = vmatpush3.bf16.msra.mxu0 %v283_v3  ;;  %v20_v15 = vld [vmem:[%s420_s1 + $0x20] sm:$0x7]  ;;  %v299_v16 = vpack.c.bf16 %v26_v14, %v25_v13  ;;  %v28_v18 = vld [vmem:[%s422_s2 + $0x38] sm:$0xff]  ;;  %v15_v19 = vld [vmem:[%s421_s0 + $0x8] sm:$0xff] }
   0x6   :  { %288 = vmatprep.subr.bf16.mxu0 %v287_v6  ;;  %292 = vmatprep.subr.bf16.mxu1 %v291_v9  ;;  %v303_v20 = vpack.c.bf16 %v28_v18, %v27_v17  ;;  %v29_v21 = vld [vmem:[%s422_s2 + $0x40] sm:$0xff]  ;;  %v30_v22 = vld [vmem:[%s422_s2 + $0x48] sm:$0xff]  ;;  %v31_v24 = vld [vmem:[%s422_s2 + $0x50] sm:$0xff] }
   0x7   :  { %294 = vmatpush3.bf16.msra.mxu1 %v291_v9  ;;  %v307_v23 = vpack.c.bf16 %v30_v22, %v29_v21  ;;  %v32_v25 = vld [vmem:[%s422_s2 + $0x58] sm:$0xff]  ;;  %v33_v27 = vld [vmem:[%s422_s2 + $0x60] sm:$0xff]  ;;  %v34_v28 = vld [vmem:[%s422_s2 + $0x68] sm:$0xff] }
   0x8   :  { %296 = vmatprep.subr.bf16.mxu1 %v295_v12  ;;  %v311_v26 = vpack.c.bf16 %v32_v25, %v31_v24  ;;  %v315_v29 = vpack.c.bf16 %v34_v28, %v33_v27  ;;  %v35_v30 = vld [vmem:[%s422_s2 + $0x70] sm:$0xff]  ;;  %v36_v31 = vld [vmem:[%s422_s2 + $0x78] sm:$0xff] }
   0x9   :  { %290 = vmatpush3.bf16.msra.mxu0 %v287_v6  ;;  %v319_v32 = vpack.c.bf16 %v36_v31, %v35_v30 }
   0xa   :  { %243 = vmatprep.subr.msk.mxu0 %vm44_vm1, %v20_v15 }
   0xb   :  { %298 = vmatpush3.bf16.msra.mxu1 %v295_v12 }
   0xc   :  { %300 = vmatprep.subr.bf16.mxu1 %v299_v16 }
   0xd   :  { %244 = vmatpush3.msk.msra.mxu0 %vm44_vm1, %v20_v15 }
   0xe   :  { %246 = vmatmul.mubr.msk.f32.vlgmr.msra.gmra.mrb[0].mxu0 %vm37_vm0, %v15_v19 }
   0xf   :  { %302 = vmatpush3.bf16.msra.mxu1 %v299_v16 }
  0x10   :  { %304 = vmatprep.subr.bf16.mxu1 %v303_v20 }
  0x13   :  { %306 = vmatpush3.bf16.msra.mxu1 %v303_v20 }
  0x14   :  { %308 = vmatprep.subr.bf16.mxu1 %v307_v23 }
  0x17   :  { %310 = vmatpush3.bf16.msra.mxu1 %v307_v23 }
  0x18   :  { %312 = vmatprep.subr.bf16.mxu1 %v311_v26 }
  0x1b   :  { %314 = vmatpush3.bf16.msra.mxu1 %v311_v26 }
  0x1c   :  { %316 = vmatprep.subr.bf16.mxu1 %v315_v29 }
  0x1f   :  { %318 = vmatpush3.bf16.msra.mxu1 %v315_v29 }
  0x20   :  { %320 = vmatprep.subr.bf16.mxu1 %v319_v32 }
  0x23   :  { %322 = vmatpush3.bf16.msra.mxu1 %v319_v32 }
  0xe1   :  { %v247_v33 = vpop.f32.mrb[0].mxu0 }
  0xe2   :  { %v114_v34 = vpop.f32.mrb[1].mxu0  ;;  %v124_v36 = vmax.f32 %v247_v33, 0.0 }
  0xe3   :  { %v123_v35 = vmax.f32 %v114_v34, 0.0 }
  0xe5   :  { %280 = vmatprep.mubr.f32.mxu1 %v123_v35 }
  0xe6   :  { %281 = vmatmul.mubr.f32.vlgmr.msra.gmra.mrb[0].mxu1 %v124_v36 }
 0x1b9   :  { %v282_v37 = vpop.f32.mrb[0].mxu1 }
 0x1ba   :  { %202 = vst.msk [vmem:[%s423_s3 + $0x8] sm:$0xff] %vm200_vm2, %v282_v37  ;;  %v191_v38 = vpop.f32.mrb[1].mxu1 }
 0x1bb   :  { %201 = vst.msk [vmem:[%s423_s3] sm:$0xff] %vm200_vm2, %v191_v38 }

</bundles_post_ra>
